<compile_context>
chip_gen: v6e
topology: v6e:2x2x1
jax: 0.10.0
libtpu: 0.0.40
codegen_flags: <defaults>
</compile_context>

<pallas_src>
import functools

import jax
import jax.numpy as jnp
from jax import lax
from jax.experimental import pallas as pl
from jax.experimental.pallas import tpu as pltpu


def _round_up(x, m):
    return ((x + m - 1) // m) * m


def _largest_divisor_leq(n, cap):
    for d in range(min(n, cap), 0, -1):
        if n % d == 0:
            return d
    return 1


def _tile_and_pad(dim, cap, align):
    """Pick a tile size for `dim`.  Prefer an aligned divisor (no padding)."""
    if dim <= cap:
        return dim, dim                      # full extent: always legal
    t = (cap // align) * align
    while t >= align:
        if dim % t == 0:
            return t, dim                    # exact tiling, no pad
        t -= align
    t = (cap // align) * align               # ragged fallback: pad (rare)
    return t, _round_up(dim, t)


# --------------------------------------------------------------------------- #
# Tiled, pipelined linear projection: y = x @ W + b   (bf16 MXU, f32 acc)
# --------------------------------------------------------------------------- #
def _linear_kernel(x_ref, w_ref, b_ref, o_ref, acc_ref):
    @pl.when(pl.program_id(2) == 0)
    def _():
        acc_ref[...] = jnp.zeros_like(acc_ref)

    # bf16 operands on the MXU (in-VMEM cast: no extra HBM cast pass), f32 acc.
    acc_ref[...] += jnp.dot(
        x_ref[...].astype(jnp.bfloat16),
        w_ref[...].astype(jnp.bfloat16),
        preferred_element_type=jnp.float32,
    )

    @pl.when(pl.program_id(2) == pl.num_programs(2) - 1)
    def _():
        o_ref[...] = (acc_ref[...] + b_ref[...].astype(jnp.float32)).astype(o_ref.dtype)


def pallas_linear(x2d, w, b, *, bm=512, bn=512, bk=512, out_dtype=None):
    """x2d: (M, K), w: (K, N), b: (N,) -> (M, N) in out_dtype."""
    M, K = x2d.shape
    Kw, N = w.shape
    assert K == Kw, (K, Kw)
    out_dtype = out_dtype or x2d.dtype

    tm, Mp = _tile_and_pad(M, bm, 8)
    tn, Np = _tile_and_pad(N, bn, 128)
    tk, Kp = _tile_and_pad(K, bk, 128)

    # Padding only on the rare ragged fallback. K is padded with zeros on both
    # operands, so the extra K blocks accumulate exact zeros (no masking needed).
    xp = x2d if (Mp == M and Kp == K) else jnp.pad(x2d, ((0, Mp - M), (0, Kp - K)))
    wp = w if (Kp == K and Np == N) else jnp.pad(w, ((0, Kp - K), (0, Np - N)))
    b2d = b.reshape(1, N).astype(jnp.float32)
    if Np != N:
        b2d = jnp.pad(b2d, ((0, 0), (0, Np - N)))

    grid = (Mp // tm, Np // tn, Kp // tk)
    out = pl.pallas_call(
        _linear_kernel,
        out_shape=jax.ShapeDtypeStruct((Mp, Np), out_dtype),
        grid_spec=pltpu.PrefetchScalarGridSpec(
            num_scalar_prefetch=0,
            grid=grid,
            in_specs=[
                pl.BlockSpec((tm, tk), lambda i, j, k: (i, k)),
                pl.BlockSpec((tk, tn), lambda i, j, k: (k, j)),
                pl.BlockSpec((1, tn), lambda i, j, k: (0, j)),
            ],
            out_specs=pl.BlockSpec((tm, tn), lambda i, j, k: (i, j)),
            scratch_shapes=[pltpu.VMEM((tm, tn), jnp.float32)],
        ),
        compiler_params=pltpu.CompilerParams(
            dimension_semantics=("parallel", "parallel", "arbitrary"),
            vmem_limit_bytes=32 * 1024 * 1024,  # safe on v5e/v6e and v7x (64 MiB part)
        ),
    )(xp, wp, b2d)
    if Mp != M or Np != N:
        out = out[:M, :N]
    return out


# --------------------------------------------------------------------------- #
# Fused q-pool + mask-unit attention.
#   Reads q/k/v blocks straight from the (B, tpw, W, 3*heads, hd) view of the
#   QKV output; writes (wb, n_q, heads*hd) blocks directly in the proj-input
#   layout -> no HBM permutes anywhere.
# --------------------------------------------------------------------------- #
def _mua_attn_kernel(q_ref, k_ref, v_ref, o_ref, *, q_stride, scale):
    # q/k/v refs: (tpw, wb, heads, hd);  o ref: (wb, n_q, heads*hd)
    tpw, wb, heads, hd = q_ref.shape
    n_q = tpw // q_stride

    # Static unroll over (window, head) groups.  On TPU a "batched" einsum
    # lowers to a loop of 2-D vmatmuls anyway, so this costs nothing extra and
    # avoids cross-sublane relayouts of k/v.
    for w in range(wb):
        head_outs = []
        for h in range(heads):
            # q max-pool over the stride axis (q_stride is the outer split of
            # tpw, matching q.view(..., q_stride, n_q, hd).max(dim=stride)).
            pooled = q_ref[pl.ds(0, n_q), w, h, :]
            for s in range(1, q_stride):
                pooled = jnp.maximum(pooled, q_ref[pl.ds(s * n_q, n_q), w, h, :])
            pooled = pooled * scale                      # scale on the small tensor

            k_wh = k_ref[:, w, h, :]                     # (tpw, hd)
            v_wh = v_ref[:, w, h, :]                     # (tpw, hd)

            # Scores: contract hd directly (NT matmul, no explicit transpose).
            s_mat = lax.dot_general(
                pooled, k_wh, (((1,), (1,)), ((), ())),
                preferred_element_type=jnp.float32)       # (n_q, tpw)

            # Numerically stable softmax in f32; normalization folded into the
            # output via the EUP approximate reciprocal (~1e-3 rel error).
            m = jnp.max(s_mat, axis=-1, keepdims=True)
            p = jnp.exp(s_mat - m)
            denom = jnp.sum(p, axis=-1, keepdims=True)
            out_h = jnp.dot(p.astype(v_wh.dtype), v_wh,
                            preferred_element_type=jnp.float32)  # (n_q, hd)
            out_h = out_h * pl.reciprocal(denom, approx=True)
            head_outs.append(out_h)

        merged = head_outs[0] if heads == 1 else jnp.concatenate(head_outs, axis=-1)
        o_ref[w] = merged.astype(o_ref.dtype)            # (n_q, heads*hd), lane-dense


def pallas_mua_attention(qkv5, *, q_stride, scale,
                         max_groups_per_step=32,
                         target_block_bytes=2 * 1024 * 1024):
    """qkv5: (B, tpw, W, 3*heads, hd) -> (B, W, n_q, heads*hd)."""
    B, tpw, W, three_heads, hd = qkv5.shape
    heads = three_heads // 3
    n_q = tpw // q_stride
    dim_out = heads * hd
    itemsize = jnp.dtype(qkv5.dtype).itemsize

    # Windows per grid step: a divisor of W (no padding), bounded by the static
    # unroll budget and a ~2 MB q+k+v block target per step.
    cap_unroll = max(1, max_groups_per_step // heads)
    cap_bytes = max(1, target_block_bytes // max(1, 3 * tpw * dim_out * itemsize))
    wb = _largest_divisor_leq(W, max(1, min(cap_unroll, cap_bytes)))

    grid = (B, W // wb)
    kernel = functools.partial(_mua_attn_kernel, q_stride=q_stride, scale=scale)

    qkv_block = (None, tpw, wb, heads, hd)               # dim3 block = one of q/k/v
    return pl.pallas_call(
        kernel,
        out_shape=jax.ShapeDtypeStruct((B, W, n_q, dim_out), qkv5.dtype),
        grid=grid,
        in_specs=[
            pl.BlockSpec(qkv_block, lambda b, wi: (b, 0, wi, 0, 0)),   # q
            pl.BlockSpec(qkv_block, lambda b, wi: (b, 0, wi, 1, 0)),   # k
            pl.BlockSpec(qkv_block, lambda b, wi: (b, 0, wi, 2, 0)),   # v
        ],
        out_specs=pl.BlockSpec((None, wb, n_q, dim_out), lambda b, wi: (b, wi, 0, 0)),
        compiler_params=pltpu.CompilerParams(
            dimension_semantics=("parallel", "parallel"),
            vmem_limit_bytes=32 * 1024 * 1024,
        ),
    )(qkv5, qkv5, qkv5)


# --------------------------------------------------------------------------- #
# Module wrapper (glue in plain JAX: only metadata reshapes, no transposes)
# --------------------------------------------------------------------------- #
class MaskUnitAttentionPallas:
    def __init__(self, dim, dim_out, heads, q_stride=1, window_size=0,
                 use_mask_unit_attn=False, key=None):
        self.dim = dim
        self.dim_out = dim_out
        self.heads = heads
        self.q_stride = q_stride
        self.head_dim = dim_out // heads
        self.scale = self.head_dim ** (-0.5)
        self.window_size = window_size
        self.use_mask_unit_attn = use_mask_unit_attn

        key = jax.random.PRNGKey(0) if key is None else key
        k1, k2, k3, k4 = jax.random.split(key, 4)
        # Weights stored (in, out) and already bf16 (MXU-native, no cast pass).
        # TODO(synk): optional fp8 weight path for the projections on v7x.
        self.w_qkv = (jax.random.normal(k1, (dim, 3 * dim_out), jnp.float32) * 0.05
                      ).astype(jnp.bfloat16)
        self.b_qkv = jax.random.normal(k2, (3 * dim_out,), jnp.float32) * 0.05
        self.w_proj = (jax.random.normal(k3, (dim_out, dim_out), jnp.float32) * 0.05
                       ).astype(jnp.bfloat16)
        self.b_proj = jax.random.normal(k4, (dim_out,), jnp.float32) * 0.05

    def _num_windows(self, N):
        W = N // (self.q_stride * self.window_size) if self.use_mask_unit_attn else 1
        if W == 0 and self.use_mask_unit_attn:
            W = 1
        return W

    def __call__(self, x):
        B, N, _ = x.shape
        W = self._num_windows(N)
        tpw = N // W
        if tpw % self.q_stride != 0:
            raise ValueError(
                f"tokens-per-window {tpw} not divisible by q_stride {self.q_stride}")
        n_q = tpw // self.q_stride

        # QKV projection: bf16 operands / f32 accumulation, bf16 output halves
        # the attention-path HBM traffic.
        qkv = pallas_linear(x.reshape(B * N, self.dim), self.w_qkv, self.b_qkv,
                            out_dtype=jnp.bfloat16)

        # Free (contiguous) 5-D view: (B, tpw, W, 3*heads, hd).
        qkv5 = qkv.reshape(B, tpw, W, 3 * self.heads, self.head_dim)

        # Fused q-pool + softmax attention; output lands directly in the
        # proj-input layout (B, W, n_q, heads*hd) -> no HBM permutes.
        # TODO(synk): flash-style KV tiling for global attention (W == 1, very
        # large tpw) so the per-group (n_q, tpw) score tile stays VMEM-bounded.
        o = pallas_mua_attention(qkv5, q_stride=self.q_stride, scale=self.scale)

        # Output projection (tiled Pallas matmul), f32 result.
        out = pallas_linear(o.reshape(B * W * n_q, self.dim_out),
                            self.w_proj, self.b_proj, out_dtype=jnp.float32)
        return out.reshape(B, W * n_q, self.dim_out)

    # Pure-JAX reference mirroring the PyTorch forward (same permutes as the
    # original module, same bf16-operand / f32-accumulate numerics as the
    # kernels; only the approximate softmax reciprocal differs).
    def reference(self, x):
        B, N, _ = x.shape
        W = self._num_windows(N)
        hd = self.head_dim
        qkv = jnp.dot(x.reshape(B * N, self.dim).astype(jnp.bfloat16), self.w_qkv,
                      preferred_element_type=jnp.float32) + self.b_qkv
        qkv = qkv.astype(jnp.bfloat16)
        qkv = qkv.reshape(B, -1, W, 3, self.heads, hd)
        qkv = jnp.transpose(qkv, (3, 0, 4, 2, 1, 5))        # (3, B, H, W, tpw, hd)
        q, k, v = qkv[0], qkv[1], qkv[2]
        if self.q_stride > 1:
            q = jnp.max(q.reshape(B, self.heads, W, self.q_stride, -1, hd), axis=3)
        s = jnp.einsum('bhwqd,bhwkd->bhwqk', q * self.scale, k,
                       preferred_element_type=jnp.float32)
        m = jnp.max(s, axis=-1, keepdims=True)
        p = jnp.exp(s - m)
        denom = jnp.sum(p, axis=-1, keepdims=True)
        o = jnp.einsum('bhwqk,bhwkd->bhwqd', p.astype(jnp.bfloat16), v,
                       preferred_element_type=jnp.float32) / denom
        o = o.astype(jnp.bfloat16)
        n_q = o.shape[-2]
        o = jnp.transpose(o, (0, 2, 3, 1, 4)).reshape(B, W * n_q, self.dim_out)
        out = jnp.dot(o.reshape(-1, self.dim_out), self.w_proj,
                      preferred_element_type=jnp.float32) + self.b_proj
        return out.reshape(B, W * n_q, self.dim_out)


# --------------------------------------------------------------------------- #
if __name__ == "__main__":
    B, N = 2, 16
    dim, dim_out, heads = 32, 32, 2
    q_stride, window_size = 2, 4

    key = jax.random.PRNGKey(0)
    kx, kp = jax.random.split(key)
    x = jax.random.normal(kx, (B, N, dim), jnp.float32)

    module = MaskUnitAttentionPallas(
        dim, dim_out, heads,
        q_stride=q_stride, window_size=window_size,
        use_mask_unit_attn=True, key=kp,
    )

    out = jax.block_until_ready(module(x))
    ref = jax.block_until_ready(module.reference(x))

    assert out.shape == ref.shape == (B, N // q_stride, dim_out), (out.shape, ref.shape)
    max_err = float(jnp.max(jnp.abs(out - ref)))
    assert jnp.allclose(out, ref, atol=1e-2, rtol=1e-2), max_err

    print("KERNEL_OK")
</pallas_src>

<mosaic_0001>
module attributes {stable_mosaic.version = 11 : i64} {
  func.func @_linear_kernel(%arg0: i32, %arg1: i32, %arg2: i32, %arg3: memref<32x32xf32, #tpu.memory_space<vmem>>, %arg4: memref<32x96xbf16, #tpu.memory_space<vmem>>, %arg5: memref<1x96xf32, #tpu.memory_space<vmem>>, %arg6: memref<32x96xbf16, #tpu.memory_space<vmem>>, %arg7: memref<32x96xf32, #tpu.memory_space<vmem>>) attributes {dimension_semantics = [#tpu.dimension_semantics<parallel>, #tpu.dimension_semantics<parallel>, #tpu.dimension_semantics<arbitrary>], iteration_bounds = array<i64: 1, 1, 1>, scalar_prefetch = 0 : i64, scratch_operands = 1 : i64, tpu.core_type = #tpu.core_type<tc>, window_params = [{transform_indices = @transform_0, window_bounds = array<i64: 32, 32>}, {transform_indices = @transform_1, window_bounds = array<i64: 32, 96>}, {transform_indices = @transform_2, window_bounds = array<i64: 1, 96>}, {transform_indices = @transform_3, window_bounds = array<i64: 32, 96>}]} {
    %c0_i32 = arith.constant 0 : i32
    %0 = arith.cmpi eq, %arg2, %c0_i32 : i32
    %1 = arith.extui %0 : i1 to i32
    %c0_i32_0 = arith.constant 0 : i32
    %2 = arith.cmpi ne, %1, %c0_i32_0 : i32
    scf.if %2 {
      %cst_10 = arith.constant 0.000000e+00 : f32
      %13 = vector.broadcast %cst_10 : f32 to vector<32x96xf32>
      %c0_11 = arith.constant 0 : index
      %c0_12 = arith.constant 0 : index
      %14 = vector.load %arg7[%c0_11, %c0_12] : memref<32x96xf32, #tpu.memory_space<vmem>>, vector<32x96xf32>
      tpu.vector_store %arg7[%c0_11, %c0_12], %13 {strides = array<i32>} : memref<32x96xf32, #tpu.memory_space<vmem>>, vector<32x96xf32>,
    } else {
    }
    %c0 = arith.constant 0 : index
    %c0_1 = arith.constant 0 : index
    %3 = vector.load %arg7[%c0, %c0_1] : memref<32x96xf32, #tpu.memory_space<vmem>>, vector<32x96xf32>
    %c0_2 = arith.constant 0 : index
    %c0_3 = arith.constant 0 : index
    %4 = vector.load %arg3[%c0_2, %c0_3] : memref<32x32xf32, #tpu.memory_space<vmem>>, vector<32x32xf32>
    %5 = arith.truncf %4 : vector<32x32xf32> to vector<32x32xbf16>
    %c0_4 = arith.constant 0 : index
    %c0_5 = arith.constant 0 : index
    %6 = vector.load %arg4[%c0_4, %c0_5] : memref<32x96xbf16, #tpu.memory_space<vmem>>, vector<32x96xbf16>
    %cst = arith.constant dense<0.000000e+00> : vector<32x96xf32>
    %7 = tpu.matmul %5, %6, %cst {dimension_numbers = #tpu.dot_dimension_numbers<[1], [0], [0], [1], [0, 0, 1, 1], [], []>} : vector<32x32xbf16>, vector<32x96xbf16>, vector<32x96xf32> -> vector<32x96xf32>
    %8 = arith.addf %3, %7 : vector<32x96xf32>
    %c0_6 = arith.constant 0 : index
    %c0_7 = arith.constant 0 : index
    %9 = vector.load %arg7[%c0_6, %c0_7] : memref<32x96xf32, #tpu.memory_space<vmem>>, vector<32x96xf32>
    tpu.vector_store %arg7[%c0_6, %c0_7], %8 {strides = array<i32>} : memref<32x96xf32, #tpu.memory_space<vmem>>, vector<32x96xf32>,
    %c0_i32_8 = arith.constant 0 : i32
    %10 = arith.cmpi eq, %arg2, %c0_i32_8 : i32
    %11 = arith.extui %10 : i1 to i32
    %c0_i32_9 = arith.constant 0 : i32
    %12 = arith.cmpi ne, %11, %c0_i32_9 : i32
    scf.if %12 {
      %c0_10 = arith.constant 0 : index
      %c0_11 = arith.constant 0 : index
      %13 = vector.load %arg7[%c0_10, %c0_11] : memref<32x96xf32, #tpu.memory_space<vmem>>, vector<32x96xf32>
      %c0_12 = arith.constant 0 : index
      %c0_13 = arith.constant 0 : index
      %14 = vector.load %arg5[%c0_12, %c0_13] : memref<1x96xf32, #tpu.memory_space<vmem>>, vector<1x96xf32>
      %15 = vector.broadcast %14 : vector<1x96xf32> to vector<32x96xf32>
      %16 = arith.addf %13, %15 : vector<32x96xf32>
      %17 = arith.truncf %16 : vector<32x96xf32> to vector<32x96xbf16>
      %c0_14 = arith.constant 0 : index
      %c0_15 = arith.constant 0 : index
      %18 = vector.load %arg6[%c0_14, %c0_15] : memref<32x96xbf16, #tpu.memory_space<vmem>>, vector<32x96xbf16>
      tpu.vector_store %arg6[%c0_14, %c0_15], %17 {strides = array<i32>} : memref<32x96xbf16, #tpu.memory_space<vmem>>, vector<32x96xbf16>,
    } else {
    }
    return
  }
  func.func @transform_0(%arg0: i32, %arg1: i32, %arg2: i32) -> (i32, i32) {
    %c0_i32 = arith.constant 0 : i32
    return %arg0, %arg2 : i32, i32
  }
  func.func @transform_1(%arg0: i32, %arg1: i32, %arg2: i32) -> (i32, i32) {
    %c0_i32 = arith.constant 0 : i32
    return %arg2, %arg1 : i32, i32
  }
  func.func @transform_2(%arg0: i32, %arg1: i32, %arg2: i32) -> (i32, i32) {
    %c0_i32 = arith.constant 0 : i32
    %c0_i32_0 = arith.constant 0 : i32
    return %c0_i32, %arg1 : i32, i32
  }
  func.func @transform_3(%arg0: i32, %arg1: i32, %arg2: i32) -> (i32, i32) {
    %c0_i32 = arith.constant 0 : i32
    return %arg0, %arg1 : i32, i32
  }
}

</mosaic_0001>

<bundles_post_ra>
// kernel: tpu_custom_call.1
= control target key start
LH: loop header
LB: loop body
LE: loop exit
PB: predicated region body
PF: predicated region fallthrough
CT: control target
= control target key end

     0   :  { %8 = vsyncpa [#allocation4], 0  ;;  %s360_s0 = inlined_call_operand.hbm [shape: f32[32,32], index: 0, kind: input, shape index: {}]   ;;  %s361_s1 = inlined_call_operand.hbm [shape: bf16[32,96], index: 1, kind: input, shape index: {}]   ;;  %s362_s2 = inlined_call_operand.vmem [shape: f32[1,96], index: 2, kind: input, shape index: {}]   ;;  %s363_s3 = inlined_call_operand.hbm [shape: bf16[32,96], index: 3, kind: output, shape index: {}]  }
   0x1   :  { %9 = vsyncpa [#allocation7], 0 }
   0x2   :  { %10 = vsyncpa [#allocation5], 0  ;;  %s302_s12 = smov [#allocation3]  }
   0x3   :  { %s16_s13 = sshll.u32 %s302_s12, 4  ;;  %s17_s13 = int_to_ptr.vmem [resolvable:$true] %s16_s13 }
   0x4   :  { %s244_s14 = scalar_lea.vmem %s17_s13, 512  ;;  %p249_p1 = scmp.lt.s32.totalorder %s17_s13, %s17_s13 }
   0x5   :  { %p245_p0 = scmp.ne.s32.totalorder %s17_s13, %s244_s14  ;;  %p250_p2 = scmp.lt.s32.totalorder %s244_s14, %s244_s14 }
   0x7   :  { %p251_p3 = por %p250_p2, %p249_p1 }
   0x9   :  { %p252_p4 = pnand %p251_p3, %p245_p0 }
   0xb   :  { %255 = shalt.err (!%p252_p4)
}
   0xc   :  { %s303_s15 = smov 128   ;;  %s304_s16 = smov 8  }
   0xd   :  { %22 = dma.hbm_to_vmem [thread:$0]  %s360_s0, 512, %s17_s13, [#allocation4], %s303_s15, %s303_s15, %s304_s16  }
   0xe   :  { %s305_s19 = smov [#allocation6]  }
   0xf   :  { %s28_s20 = sshll.u32 %s305_s19, 4  ;;  %s29_s20 = int_to_ptr.vmem [resolvable:$true] %s28_s20 }
  0x10   :  { %s264_s21 = scalar_lea.vmem %s29_s20, 256  ;;  %p269_p6 = scmp.lt.s32.totalorder %s29_s20, %s29_s20 }
  0x11   :  { %p265_p5 = scmp.ne.s32.totalorder %s29_s20, %s264_s21  ;;  %p270_p7 = scmp.lt.s32.totalorder %s264_s21, %s264_s21 }
  0x13   :  { %p271_p8 = por %p270_p7, %p269_p6 }
  0x15   :  { %p272_p9 = pnand %p271_p8, %p265_p5 }
  0x17   :  { %275 = shalt.err (!%p272_p9)
}
  0x18   :  { %s306_s22 = smov 64   ;;  %s307_s23 = smov 4  }
  0x19   :  { %34 = dma.hbm_to_vmem [thread:$0]  %s361_s1, 256, %s29_s20, [#allocation7], %s306_s22, %s306_s22, %s307_s23  }
  0x1a   :  { %296 = dma.done.wait [#allocation4], 512  }
  0x1b   :  { %297 = vsyncadd [#allocation4], 4294966784 }
  0x1c   :  { %298 = dma.done.wait [#allocation7], 256  }
  0x1d   :  { %299 = vsyncadd [#allocation7], 4294967040  ;;  %vm48_vm0 = vcmask 785408   ;;  %v308_v0 = vmov 0.0   ;;  %v234_v1 = vld [vmem:[#allocation6 + $0x8] sm:$0xff]   ;;  %v235_v2 = vld [vmem:[#allocation6] sm:$0xff]  }
  0x1e   :  { %51 = vst.msk [vmem:[#allocation2 + $0x10] sm:$0xff] %vm48_vm0, %v308_v0  ;;  %49 = vst.msk [vmem:[#allocation2] sm:$0xff] %vm48_vm0, %v308_v0  ;;  %218 = vmatprep.subr.bf16.mxu0 %v234_v1  ;;  %v57_v3 = vld [vmem:[#allocation3] sm:$0xff]  ;;  %v58_v4 = vld [vmem:[#allocation3 + $0x8] sm:$0xff]  ;;  %vm79_vm1 = vcmask 261120   ;;  %vm178_vm2 = vcmask 781312  }
  0x1f   :  { %50 = vst.msk [vmem:[#allocation2 + $0x8] sm:$0xff] %vm48_vm0, %v308_v0  ;;  %52 = vst.msk [vmem:[#allocation2 + $0x18] sm:$0xff] %vm48_vm0, %v308_v0  ;;  %219 = vmatpush3.bf16.msra.mxu0 %v234_v1  ;;  %v61_v5 = vpack.c.bf16 %v58_v4, %v57_v3  ;;  %v59_v6 = vld [vmem:[#allocation3 + $0x10] sm:$0xff]  ;;  %v60_v7 = vld [vmem:[#allocation3 + $0x18] sm:$0xff]  ;;  %s309_s26 = smov [#allocation8]  }
  0x20   :  { %220 = vmatprep.subr.bf16.mxu0 %v235_v2  ;;  %v62_v8 = vpack.c.bf16 %v60_v7, %v59_v6  ;;  %v205_v21 = vld [vmem:[%s362_s2] ss:$0 sm:$0xff]  ;;  %s188_s27 = sshll.u32 %s309_s26, 4  ;;  %s189_s27 = int_to_ptr.vmem [resolvable:$true] %s188_s27 }
  0x21   :  { %222 = vmatprep.mubr.msk.bf16.mxu0 %vm79_vm1, %v61_v5  ;;  %s276_s2 = scalar_lea.vmem %s189_s27, 256  ;;  %p281_p11 = scmp.lt.s32.totalorder %s189_s27, %s189_s27 }
  0x22   :  { %p277_p10 = scmp.ne.s32.totalorder %s189_s27, %s276_s2  ;;  %p282_p12 = scmp.lt.s32.totalorder %s276_s2, %s276_s2 }
  0x23   :  { %221 = vmatpush3.bf16.msra.mxu0 %v235_v2 }
  0x24   :  { %p283_p13 = por %p282_p12, %p281_p11 }
  0x25   :  { %v55_v9 = vld [vmem:[#allocation2 + $0x10] sm:$0xff]  ;;  %v53_v11 = vld [vmem:[#allocation2] sm:$0xff] }
  0x26   :  { %223 = vmatmul.mubr.msk.bf16.vlgmr.msra.gmra.mxu0 %vm79_vm1, %v62_v8  ;;  %v56_v14 = vld [vmem:[#allocation2 + $0x18] sm:$0xff]  ;;  %v54_v17 = vld [vmem:[#allocation2 + $0x8] sm:$0xff]  ;;  %p284_p0 = pnand %p283_p13, %p277_p10 }
  0xe6   :  { %v224_v10 = vpop.f32.mrf.mxu0 }
  0xe7   :  { %v137_v12 = vadd.f32 %v224_v10, %v55_v9 }
  0xe8   :  { %v120_v13 = vpop.f32.mrf.mxu0 }
  0xe9   :  { %142 = vst.msk [vmem:[#allocation2 + $0x10] sm:$0xff] %vm48_vm0, %v137_v12  ;;  %v135_v15 = vadd.f32 %v120_v13, %v53_v11 }
  0xea   :  { %v225_v16 = vpop.f32.mrf.mxu0 }
  0xeb   :  { %140 = vst.msk [vmem:[#allocation2] sm:$0xff] %vm48_vm0, %v135_v15  ;;  %v138_v18 = vadd.f32 %v225_v16, %v56_v14 }
  0xec   :  { %v123_v19 = vpop.f32.mrf.mxu0 }
  0xed   :  { %143 = vst.msk [vmem:[#allocation2 + $0x18] sm:$0xff] %vm48_vm0, %v138_v18  ;;  %v136_v20 = vadd.f32 %v123_v19, %v54_v17 }
  0xef   :  { %141 = vst.msk [vmem:[#allocation2 + $0x8] sm:$0xff] %vm48_vm0, %v136_v20 }
  0xf0   :  { %v149_v22 = vld [vmem:[#allocation2 + $0x10] sm:$0xff] }
  0xf1   :  { %v160_v23 = vadd.f32 %v205_v21, %v149_v22 }
  0xf2   :  { %v147_v24 = vld [vmem:[#allocation2] sm:$0xff] }
  0xf3   :  { %v158_v25 = vadd.f32 %v205_v21, %v147_v24  ;;  %v212_v26 = vpack.c.bf16 %v160_v23, %v160_v23 }
  0xf4   :  { %v150_v27 = vld [vmem:[#allocation2 + $0x18] sm:$0xff] }
  0xf5   :  { %v161_v28 = vadd.f32 %v205_v21, %v150_v27  ;;  %v210_v29 = vpack.c.bf16 %v158_v25, %v158_v25  ;;  %181 = vst.msk [vmem:[#allocation8 + $0x8] sm:$0xf] %vm178_vm2, %v212_v26 }
  0xf6   :  { %v148_v30 = vld [vmem:[#allocation2 + $0x8] sm:$0xff] }
  0xf7   :  { %v159_v31 = vadd.f32 %v205_v21, %v148_v30  ;;  %v213_v32 = vpack.c.bf16 %v161_v28, %v161_v28  ;;  %179 = vst.msk [vmem:[#allocation8] sm:$0xf] %vm178_vm2, %v210_v29 }
  0xf9   :  { %v211_v33 = vpack.c.bf16 %v159_v31, %v159_v31  ;;  %182 = vst.msk [vmem:[#allocation8 + $0xc] sm:$0xf] %vm178_vm2, %v213_v32 }
  0xfb   :  { %180 = vst.msk [vmem:[#allocation8 + $0x4] sm:$0xf] %vm178_vm2, %v211_v33 }
  0xfc   :  { %287 = shalt.err (!%p284_p0)
}
  0xfd   :  { %194 = dma.vmem_to_hbm [thread:$0]  %s189_s27, 256, %s363_s3, [#allocation5], %s306_s22, %s306_s22, %s307_s23  }
  0xfe   :  { %300 = dma.done.wait [#allocation5], 256  }
  0xff   :  { %301 = vsyncadd [#allocation5], 4294967040 }
 0x100   :  { %198 = vsyncpa [#allocation4], 1 }
 0x101   :  { %199 = vsyncpa [#allocation7], 1 }
 0x102   :  { %200 = vsyncpa [#allocation5], 1 }

</bundles_post_ra>
